<compile_context>
chip_gen: v7x
topology: tpu7x:2x2x1
jax: 0.10.0
libtpu: 0.0.40
codegen_flags: <defaults>
</compile_context>

<pallas_src>
import jax
import jax.numpy as jnp
from jax.experimental import pallas as pl
from jax.experimental.pallas import tpu as pltpu


def _ftl_stats_kernel(pred_ref, tgt_ref, acc_ref):
    """pred_ref: (1, C, T) f32 logits; tgt_ref: (1, 1, T) i32 labels;
    acc_ref (output, resident accumulator): (3, C, T) f32 partial stats."""
    n = pl.program_id(0)
    j = pl.program_id(1)

    @pl.when(jnp.logical_and(n == 0, j == 0))
    def _():
        acc_ref[...] = jnp.zeros_like(acc_ref)

    # ---- hot path: softmax over the C sublane rows (lane-dense) ----
    logits = pred_ref[0].astype(jnp.float32)                     # (C, T)
    m = jnp.max(logits, axis=0, keepdims=True)                   # (1, T)
    e = jnp.exp(logits - m)                                      # EUP
    p = e * pl.reciprocal(jnp.sum(e, axis=0, keepdims=True),
                          approx=True)                           # (C, T)

    tgt = tgt_ref[0]                                             # (1, T) int32
    classes = jax.lax.broadcasted_iota(jnp.int32, logits.shape, 0)
    onehot = (tgt == classes).astype(jnp.float32)                # (C, T)

    # Lane-wide partial accumulation (pure VPU adds); the cross-lane
    # reduction is deferred to the JAX wrapper.
    acc_ref[0] += p * onehot        # -> tp_c
    acc_ref[1] += p                 # -> sum_c p  (fp = sum_p - tp)
    acc_ref[2] += onehot            # -> count_c  (fn = count - tp)


def focal_tversky_loss(pred, target, *, smooth=1.0, alpha=0.5, beta=0.5,
                       gamma=1, tile_p=8192):
    """pred: (N, C, H, W) float logits; target: (N, H, W) int class labels."""
    N, C, H, W = pred.shape
    if C == 1:
        # TODO(synk): binary (num_classes==1) sigmoid branch not implemented;
        # the example forward uses the multi-class softmax branch (C=4).
        raise NotImplementedError("num_classes == 1 path not implemented")

    HW = H * W
    tile_p = min(int(tile_p), HW)
    # TODO(synk): add pixel padding + validity masking for shapes where H*W
    # is not a multiple of the tile size / 128.
    assert HW % tile_p == 0, "H*W must be divisible by the pixel tile size"
    assert tile_p % 128 == 0 or tile_p == HW, "tile must be lane-aligned"
    grid = (N, HW // tile_p)

    # Free reshapes of the NCHW input -- no transpose / extra HBM pass.
    pred3 = pred.reshape(N, C, HW).astype(jnp.float32)
    tgt3 = target.reshape(N, 1, HW).astype(jnp.int32)

    # TODO(synk): on v7x, split the pixel axis over the 2 TensorCores with a
    # leading "parallel" grid axis and per-core accumulator slots.
    acc = pl.pallas_call(
        _ftl_stats_kernel,
        out_shape=jax.ShapeDtypeStruct((3, C, tile_p), jnp.float32),
        grid_spec=pltpu.PrefetchScalarGridSpec(
            num_scalar_prefetch=0,
            grid=grid,
            in_specs=[
                pl.BlockSpec((1, C, tile_p), lambda n, j: (n, 0, j)),
                pl.BlockSpec((1, 1, tile_p), lambda n, j: (n, 0, j)),
            ],
            out_specs=pl.BlockSpec((3, C, tile_p), lambda n, j: (0, 0, 0)),
        ),
        compiler_params=pltpu.CompilerParams(
            dimension_semantics=("arbitrary", "arbitrary")),
    )(pred3, tgt3)

    # Tiny epilogue in JAX: reduce the lane-wide partials and finish the loss.
    stats = jnp.sum(acc, axis=-1)                 # (3, C)
    tp = stats[0]
    fp = stats[1] - tp                            # sum(p) - tp
    fn = stats[2] - tp                            # count  - tp
    tversky = (tp + smooth) / (tp + alpha * fp + beta * fn + smooth)
    focal = (1.0 - tversky) ** gamma
    return jnp.mean(focal)


def _reference(pred, target, smooth=1.0, alpha=0.5, beta=0.5, gamma=1):
    N, C, H, W = pred.shape
    p = jnp.transpose(pred, (0, 2, 3, 1)).reshape(-1, C)
    p = jax.nn.softmax(p, axis=1)
    t = target.reshape(-1)
    losses = []
    for c in range(C):
        tc = (t == c).astype(jnp.float32)
        ic = p[:, c]
        tp = jnp.sum(ic * tc)
        fp = jnp.sum((1 - tc) * ic)
        fn = jnp.sum(tc * (1 - ic))
        tv = (tp + smooth) / (tp + alpha * fp + beta * fn + smooth)
        losses.append((1 - tv) ** gamma)
    return jnp.mean(jnp.stack(losses))


if __name__ == "__main__":
    key = jax.random.PRNGKey(0)
    k1, k2 = jax.random.split(key)
    N, C, H, W = 2, 4, 16, 16
    pred = jax.random.normal(k1, (N, C, H, W), dtype=jnp.float32)
    target = jax.random.randint(k2, (N, H, W), 0, C, dtype=jnp.int32)

    loss = focal_tversky_loss(pred, target)
    loss = jax.block_until_ready(loss)

    ref = _reference(pred, target)
    # approx reciprocal in the softmax denominator -> loosen tolerance a bit.
    assert jnp.allclose(loss, ref, atol=1e-3, rtol=1e-3), (loss, ref)
    print("KERNEL_OK")
</pallas_src>

<mosaic_0001>
module attributes {stable_mosaic.version = 11 : i64} {
  func.func @_ftl_stats_kernel(%arg0: i32, %arg1: i32, %arg2: memref<1x4x256xf32, #tpu.memory_space<vmem>>, %arg3: memref<1x1x256xi32, #tpu.memory_space<vmem>>, %arg4: memref<3x4x256xf32, #tpu.memory_space<vmem>>) attributes {dimension_semantics = [#tpu.dimension_semantics<arbitrary>, #tpu.dimension_semantics<arbitrary>], iteration_bounds = array<i64: 2, 1>, scalar_prefetch = 0 : i64, scratch_operands = 0 : i64, tpu.core_type = #tpu.core_type<tc>, window_params = [{transform_indices = @transform_0, window_bounds = array<i64: 1, 4, 256>}, {transform_indices = @transform_1, window_bounds = array<i64: 1, 1, 256>}, {pipeline_mode = #tpu.pipeline_mode<synchronous>, transform_indices = @transform_2, window_bounds = array<i64: 3, 4, 256>}]} {
    %c0_i32 = arith.constant 0 : i32
    %0 = arith.cmpi eq, %arg0, %c0_i32 : i32
    %c0_i32_0 = arith.constant 0 : i32
    %1 = arith.cmpi eq, %arg1, %c0_i32_0 : i32
    %2 = arith.andi %0, %1 : i1
    %3 = arith.extui %2 : i1 to i32
    %c0_i32_1 = arith.constant 0 : i32
    %4 = arith.cmpi ne, %3, %c0_i32_1 : i32
    scf.if %4 {
      %cst_24 = arith.constant 0.000000e+00 : f32
      %43 = vector.broadcast %cst_24 : f32 to vector<3x4x256xf32>
      %c0_25 = arith.constant 0 : index
      %c0_26 = arith.constant 0 : index
      %c0_27 = arith.constant 0 : index
      %44 = vector.load %arg4[%c0_25, %c0_26, %c0_27] : memref<3x4x256xf32, #tpu.memory_space<vmem>>, vector<3x4x256xf32>
      tpu.vector_store %arg4[%c0_25, %c0_26, %c0_27], %43 {strides = array<i32>} : memref<3x4x256xf32, #tpu.memory_space<vmem>>, vector<3x4x256xf32>,
    } else {
    }
    %c0 = arith.constant 0 : index
    %c0_2 = arith.constant 0 : index
    %c0_3 = arith.constant 0 : index
    %5 = vector.load %arg2[%c0, %c0_2, %c0_3] : memref<1x4x256xf32, #tpu.memory_space<vmem>>, vector<1x4x256xf32>
    %6 = vector.shape_cast %5 : vector<1x4x256xf32> to vector<4x256xf32>
    %cst = arith.constant dense<0xFF800000> : vector<256xf32>
    %7 = vector.multi_reduction <maximumf>, %6, %cst [0] : vector<4x256xf32> to vector<256xf32>
    %8 = vector.shape_cast %7 : vector<256xf32> to vector<1x256xf32>
    %9 = vector.broadcast %8 : vector<1x256xf32> to vector<4x256xf32>
    %10 = arith.subf %6, %9 : vector<4x256xf32>
    %11 = math.exp %10 : vector<4x256xf32>
    %cst_4 = arith.constant dense<0.000000e+00> : vector<256xf32>
    %12 = vector.multi_reduction <add>, %11, %cst_4 [0] : vector<4x256xf32> to vector<256xf32>
    %13 = vector.shape_cast %12 : vector<256xf32> to vector<1x256xf32>
    %14 = tpu.reciprocal %13 {approx = true} : vector<1x256xf32> -> vector<1x256xf32>
    %15 = vector.broadcast %14 : vector<1x256xf32> to vector<4x256xf32>
    %16 = arith.mulf %11, %15 : vector<4x256xf32>
    %c0_5 = arith.constant 0 : index
    %c0_6 = arith.constant 0 : index
    %c0_7 = arith.constant 0 : index
    %17 = vector.load %arg3[%c0_5, %c0_6, %c0_7] : memref<1x1x256xi32, #tpu.memory_space<vmem>>, vector<1x1x256xi32>
    %18 = vector.shape_cast %17 : vector<1x1x256xi32> to vector<1x256xi32>
    %19 = tpu.iota {dimensions = array<i32: 0>} : vector<4x256xi32>
    %20 = vector.broadcast %18 : vector<1x256xi32> to vector<4x256xi32>
    %21 = arith.cmpi eq, %20, %19 : vector<4x256xi32>
    %22 = arith.extui %21 : vector<4x256xi1> to vector<4x256xi32>
    %23 = arith.sitofp %22 : vector<4x256xi32> to vector<4x256xf32>
    %c0_8 = arith.constant 0 : index
    %c0_9 = arith.constant 0 : index
    %c0_10 = arith.constant 0 : index
    %24 = vector.load %arg4[%c0_8, %c0_9, %c0_10] : memref<3x4x256xf32, #tpu.memory_space<vmem>>, vector<1x4x256xf32>
    %25 = vector.shape_cast %24 : vector<1x4x256xf32> to vector<4x256xf32>
    %26 = arith.mulf %16, %23 : vector<4x256xf32>
    %27 = arith.addf %25, %26 : vector<4x256xf32>
    %c0_11 = arith.constant 0 : index
    %c0_12 = arith.constant 0 : index
    %c0_13 = arith.constant 0 : index
    %28 = vector.load %arg4[%c0_11, %c0_12, %c0_13] : memref<3x4x256xf32, #tpu.memory_space<vmem>>, vector<1x4x256xf32>
    %29 = vector.shape_cast %28 : vector<1x4x256xf32> to vector<4x256xf32>
    %30 = vector.shape_cast %27 : vector<4x256xf32> to vector<1x4x256xf32>
    tpu.vector_store %arg4[%c0_11, %c0_12, %c0_13], %30 {strides = array<i32>} : memref<3x4x256xf32, #tpu.memory_space<vmem>>, vector<1x4x256xf32>,
    %c1 = arith.constant 1 : index
    %c0_14 = arith.constant 0 : index
    %c0_15 = arith.constant 0 : index
    %31 = vector.load %arg4[%c1, %c0_14, %c0_15] : memref<3x4x256xf32, #tpu.memory_space<vmem>>, vector<1x4x256xf32>
    %32 = vector.shape_cast %31 : vector<1x4x256xf32> to vector<4x256xf32>
    %33 = arith.addf %32, %16 : vector<4x256xf32>
    %c1_16 = arith.constant 1 : index
    %c0_17 = arith.constant 0 : index
    %c0_18 = arith.constant 0 : index
    %34 = vector.load %arg4[%c1_16, %c0_17, %c0_18] : memref<3x4x256xf32, #tpu.memory_space<vmem>>, vector<1x4x256xf32>
    %35 = vector.shape_cast %34 : vector<1x4x256xf32> to vector<4x256xf32>
    %36 = vector.shape_cast %33 : vector<4x256xf32> to vector<1x4x256xf32>
    tpu.vector_store %arg4[%c1_16, %c0_17, %c0_18], %36 {strides = array<i32>} : memref<3x4x256xf32, #tpu.memory_space<vmem>>, vector<1x4x256xf32>,
    %c2 = arith.constant 2 : index
    %c0_19 = arith.constant 0 : index
    %c0_20 = arith.constant 0 : index
    %37 = vector.load %arg4[%c2, %c0_19, %c0_20] : memref<3x4x256xf32, #tpu.memory_space<vmem>>, vector<1x4x256xf32>
    %38 = vector.shape_cast %37 : vector<1x4x256xf32> to vector<4x256xf32>
    %39 = arith.addf %38, %23 : vector<4x256xf32>
    %c2_21 = arith.constant 2 : index
    %c0_22 = arith.constant 0 : index
    %c0_23 = arith.constant 0 : index
    %40 = vector.load %arg4[%c2_21, %c0_22, %c0_23] : memref<3x4x256xf32, #tpu.memory_space<vmem>>, vector<1x4x256xf32>
    %41 = vector.shape_cast %40 : vector<1x4x256xf32> to vector<4x256xf32>
    %42 = vector.shape_cast %39 : vector<4x256xf32> to vector<1x4x256xf32>
    tpu.vector_store %arg4[%c2_21, %c0_22, %c0_23], %42 {strides = array<i32>} : memref<3x4x256xf32, #tpu.memory_space<vmem>>, vector<1x4x256xf32>,
    return
  }
  func.func @transform_0(%arg0: i32, %arg1: i32) -> (i32, i32, i32) {
    %c0_i32 = arith.constant 0 : i32
    %c0_i32_0 = arith.constant 0 : i32
    return %arg0, %c0_i32, %arg1 : i32, i32, i32
  }
  func.func @transform_1(%arg0: i32, %arg1: i32) -> (i32, i32, i32) {
    %c0_i32 = arith.constant 0 : i32
    %c0_i32_0 = arith.constant 0 : i32
    return %arg0, %c0_i32, %arg1 : i32, i32, i32
  }
  func.func @transform_2(%arg0: i32, %arg1: i32) -> (i32, i32, i32) {
    %c0_i32 = arith.constant 0 : i32
    %c0_i32_0 = arith.constant 0 : i32
    %c0_i32_1 = arith.constant 0 : i32
    %c0_i32_2 = arith.constant 0 : i32
    return %c0_i32, %c0_i32_0, %c0_i32_1 : i32, i32, i32
  }
}

</mosaic_0001>

<bundles_post_ra>
// kernel: tpu_custom_call.1
= control target key start
LH: loop header
LB: loop body
LE: loop exit
PB: predicated region body
PF: predicated region fallthrough
CT: control target
= control target key end

     0   :  { %7 = vsyncpa [#allocation3], 0  ;;  %s861_s0 = inlined_call_operand.hbm [shape: f32[2,4,256], index: 0, kind: input, shape index: {}]   ;;  %s862_s1 = inlined_call_operand.hbm [shape: s32[2,1,256], index: 1, kind: input, shape index: {}]   ;;  %s863_s2 = inlined_call_operand.hbm [shape: f32[3,4,256], index: 2, kind: output, shape index: {}]  }
   0x1   :  { %9 = vsyncpa [#allocation3 + $0x1], 0 }
   0x2   :  { %10 = vsyncpa [#allocation6], 0 }
   0x3   :  { %12 = vsyncpa [#allocation6 + $0x1], 0 }
   0x4   :  { %13 = vsyncpa [#allocation4], 0  ;;  %s665_s9 = smov 0   ;;  %s667_s10 = smov 0  }
   0x5   :  { %s669_s11 = smov 0   ;;  %s671_s12 = smov 0  }
   0x6   :  { %s673_s13 = smov 0   ;;  %s675_s14 = smov 0  }
   0x7 LB: > { %s397_s15 = sadd.s32 4294967295, %s641_s14   ;;  %s31_s16 = sadd.s32 1, %s637_s13  ;;  %s641_s14 = sphi %s675_s14, %s19_s14   ;;  %s637_s13 = sphi %s673_s13, %s878_s13   ;;  %s633_s12 = sphi %s671_s12, %s877_s12   ;;  %s629_s11 = sphi %s669_s11, %s876_s11   ;;  %s625_s10 = sphi %s667_s10, %s875_s10   ;;  %s621_s9 = sphi %s665_s9, %s874_s9  }
   0x8   : > { %p33_p0 = scmp.ge.s32.totalorder %s31_s16, 2  ;;  %s40_s17 = sadd.s32 1, %s629_s11 }
   0x9   : > { %p47_p1 = scmp.ne.s32.totalorder %s629_s11, %s625_s10  ;;  %p48_p2 = scmp.eq.s32.totalorder %s641_s14, 0 }
   0xa   : > { %s880_s16 = smov (%p33_p0, %s31_s16), 0  ;;  %p53_p4 = scmp.ne.s32.totalorder %s625_s10, %s621_s9 }
   0xb   : > { %p701_p3 = por %p48_p2, %p47_p1  ;;  %s35_s19 = ssub.s32 %s637_s13, %s880_s16 }
   0xc   : > { %p54_p5 = scmp.eq.s32.totalorder %s397_s15, 0  ;;  %p38_p6 = scmp.eq.s32.totalorder %s35_s19, 0 }
   0xd   : > { %p434_p8 = scmp.lt.s32.totalorder %s641_s14, 2  ;;  %s719_s22 = sand.u32 1, %s629_s11  }
   0xe   : > { %p710_p7 = por %p54_p5, %p53_p4  ;;  %s416_s23 = sshll.u32 %s637_s13, 7 }
   0xf   : > { %s716_s21 = scalar_select %p38_p6, %s629_s11, %s40_s17  }
  0x10   : > { %s866_s20 = scalar_select %p710_p7, 1, 0 }
  0x11   : > { %s400_s24 = sshll.u32 %s719_s22, 3  ;;  %s726_s27 = scalar_lea.hbm %s861_s0, %s416_s23 }
  0x12   : > { %s130_s28 = scalar_lea.vmem [#allocation2], %s400_s24  ;;  %p730_p9 = pnand %p434_p8, %p701_p3 }
  0x13   : > { %s140_s29 = sshll.u32 %s130_s28, 4  ;;  %s127_s3 = scalar_lea.sflag [#allocation3], %s719_s22  ;;  %s734_s29 = int_to_ptr.vmem [resolvable:$true] %s140_s29 }
  0x14   : > { %s497_s4 = scalar_lea.hbm %s726_s27, 128  ;;  %p499_p13 = pneg %p730_p9 }
  0x15   : > { %p498_p12 = scmp.ne.s32.totalorder %s726_s27, %s497_s4  ;;  %s502_s7 = scalar_lea.hbm %s861_s0, 256 }
  0x16   : > { %p503_p2 = scmp.lt.u32.totalorder %s726_s27, %s861_s0  ;;  %p504_p3 = scmp.lt.u32.totalorder %s502_s7, %s497_s4 }
  0x17   : > { %p500_p0 = pnand %p499_p13, %p498_p12  ;;  %p506_p5 = scmp.lt.u32.totalorder %s497_s4, %s726_s27 }
  0x18   : > { %p505_p4 = por %p504_p3, %p503_p2 }
  0x19   : > { %p501_p1 = pneg %p500_p0 }
  0x1a   : > { %p507_p6 = por %p506_p5, %p505_p4 }
  0x1c   : > { %p508_p8 = pnand %p507_p6, %p501_p1 }
  0x1e   : > { %511 = shalt.err (!%p508_p8)
}
  0x1f   : > { %s512_s17 = scalar_lea.vmem %s734_s29, 128  ;;  %s643_s18 = smov [#allocation2]  }
  0x20   : > { %p513_p12 = scmp.ne.s32.totalorder %s734_s29, %s512_s17  ;;  %s517_s19 = sshll.u32 %s643_s18, 4  ;;  %s518_s19 = int_to_ptr.vmem [resolvable:$false] %s517_s19 }
  0x21   : > { %s519_s23 = scalar_lea.vmem %s518_s19, 256  ;;  %p520_p11 = scmp.lt.s32.totalorder %s734_s29, %s518_s19 }
  0x22   : > { %p515_p0 = pnand %p513_p12, %p499_p13  ;;  %p521_p2 = scmp.lt.s32.totalorder %s519_s23, %s512_s17 }
  0x24   : > { %p516_p10 = pneg %p515_p0  ;;  %p522_p3 = por %p521_p2, %p520_p11 }
  0x26   : > { %p523_p4 = pnand %p522_p3, %p516_p10 }
  0x28   : > { %526 = shalt.err (!%p523_p4)
}
  0x29   : > { %430 = dma.hbm_to_vmem [thread:$0]  (!%p730_p9), %s726_s27, 128, %s734_s29, %s127_s3  }
  0x2a   : > { %p868_p1 = scmp.lt.s32.totalorder %s641_s14, 3  ;;  %p869_p5 = scmp.ge.s32.totalorder %s641_s14, 1 }
  0x2b   : > { %s403_s25 = sshll.u32 %s719_s22, 1  ;;  %s417_s26 = sshll.u32 %s637_s13, 5 }
  0x2c   : > { %p768_p6 = pnand %p869_p5, %p868_p1  ;;  %s777_s5 = scalar_lea.hbm %s862_s1, %s417_s26 }
  0x2d   : > { %s151_s6 = scalar_lea.vmem [#allocation5], %s403_s25  ;;  %s148_s27 = scalar_lea.sflag [#allocation6], %s719_s22 }
  0x2e   : > { %s870_s24 = scalar_select %p768_p6, 1, 0 }
  0x2f   : > { %s161_s7 = sshll.u32 %s151_s6, 4  ;;  %s527_s29 = scalar_lea.hbm %s777_s5, 32  ;;  %s162_s7 = int_to_ptr.vmem [resolvable:$true] %s161_s7 }
  0x30   : > { %p528_p10 = scmp.ne.s32.totalorder %s777_s5, %s527_s29  ;;  %s532_s9 = scalar_lea.hbm %s862_s1, 64 }
  0x31   : > { %p533_p12 = scmp.lt.u32.totalorder %s777_s5, %s862_s1  ;;  %p534_p0 = scmp.lt.u32.totalorder %s532_s9, %s527_s29 }
  0x32   : > { %p530_p11 = pnand %p528_p10, %p499_p13  ;;  %p536_p3 = scmp.lt.u32.totalorder %s527_s29, %s777_s5 }
  0x33   : > { %p535_p2 = por %p534_p0, %p533_p12 }
  0x34   : > { %p531_p8 = pneg %p530_p11 }
  0x35   : > { %p537_p4 = por %p536_p3, %p535_p2 }
  0x37   : > { %p538_p1 = pnand %p537_p4, %p531_p8 }
  0x39   : > { %541 = shalt.err (!%p538_p1)
}
  0x3a   : > { %s542_s22 = scalar_lea.vmem %s162_s7, 32  ;;  %s644_s19 = smov [#allocation5]  }
  0x3b   : > { %p543_p5 = scmp.ne.s32.totalorder %s162_s7, %s542_s22  ;;  %s547_s23 = sshll.u32 %s644_s19, 4  ;;  %s548_s23 = int_to_ptr.vmem [resolvable:$false] %s547_s23 }
  0x3c   : > { %s549_s25 = scalar_lea.vmem %s548_s23, 64  ;;  %p550_p7 = scmp.lt.s32.totalorder %s162_s7, %s548_s23 }
  0x3d   : > { %p545_p10 = pnand %p543_p5, %p499_p13  ;;  %p551_p6 = scmp.lt.s32.totalorder %s549_s25, %s542_s22 }
  0x3f   : > { %p546_p11 = pneg %p545_p10  ;;  %p552_p0 = por %p551_p6, %p550_p7 }
  0x41   : > { %p553_p12 = pnand %p552_p0, %p546_p11 }
  0x43   : > { %556 = shalt.err (!%p553_p12)
}
  0x44   : > { %433 = dma.hbm_to_vmem [thread:$0]  (!%p730_p9), %s777_s5, 32, %s162_s7, %s148_s27  }
  0x45   : > { %p871_p8 = scmp.ne.s32.totalorder %s870_s24, 0 }
  0x46   : > { %s172_s26 = sand.u32 (!%p871_p8), 1, %s625_s10   ;;  %p872_p13 = scmp.ne.s32.totalorder (!%p871_p8), %s866_s20, 0 }
  0x47   : > { %170 = sbr.rel (%p871_p8) target bundleno = 174 (0xae), region = 28  ;;  %s407_s28 = sshll.u32 (!%p871_p8), %s172_s26, 3 }
  0x48   : > { %s173_s4 = scalar_lea.sflag (!%p871_p8), [#allocation3], %s172_s26  ;;  %s176_s6 = scalar_lea.vmem (!%p871_p8), [#allocation2], %s407_s28 }
  0x4e   : > { %608 = dma.done.wait (%p872_p13), %s173_s4, 128  }
  0x4f   : > { %610 = vsyncadd (%p872_p13), %s173_s4, 4294967168  ;;  %s408_s29 = sshll.u32 %s172_s26, 1  ;;  %s182_s3 = scalar_lea.sflag [#allocation6], %s172_s26 }
  0x50   : > { %s185_s30 = scalar_lea.vmem [#allocation5], %s408_s29 }
  0x51   : > { %612 = dma.done.wait (%p872_p13), %s182_s3, 32  }
  0x52   : > { %614 = vsyncadd (%p872_p13), %s182_s3, 4294967264  ;;  %p208_p7 = scmp.eq.s32.totalorder %s633_s12, 0 }
  0x53   : > { %v645_v0 = vmov (%p208_p7), 0.0  }
  0x54   : > { %213 = sbr.rel (!%p208_p7) target bundleno = 91 (0x5b), region = 40  ;;  %214 = vst [vmem:[#allocation7] sm:$0xff] (%p208_p7), %v645_v0  ;;  %215 = vst [vmem:[#allocation7 + $0x8] sm:$0xff] (%p208_p7), %v645_v0 }
  0x55   : > { %216 = vst [vmem:[#allocation7 + $0x10] sm:$0xff] (%p208_p7), %v645_v0 }
  0x5b PF: > { %v217_v1 = vld [vmem:[%s176_s6] sm:$0xff]  ;;  %vm221_vm0 = vcmask 1043456   ;;  %v268_v2 = vlaneseq  ;;  %v267_v8 = vld [vmem:[%s185_s30] sm:$0x3]  ;;  %v646_v19 = vmov 0.0   ;;  %v284_v54 = vld [vmem:[#allocation7] sm:$0xff] }
  0x5c   : > { %v219_v3 = vcombine.high %v217_v1, %v217_v1  ;;  %v222_v4 = vsel %vm221_vm0, %v217_v1, -inf  ;;  %v297_v22 = vld [vmem:[#allocation7 + $0x10] sm:$0xff]  ;;  %v293_v52 = vld [vmem:[#allocation7 + $0x8] sm:$0xff]  ;;  %s647_s12 = smov [#allocation7]   ;;  %p817_p9 = scmp.eq.s32.totalorder %s397_s15, 1 }
  0x5d   : > { %v223_v5 = vrot.slane %v222_v4, 4  ;;  %v269_v6 = vshrl.u32 %v268_v2, 7  ;;  %s306_s20 = sshll.u32 %s647_s12, 4  ;;  %s307_s20 = int_to_ptr.vmem [resolvable:$true] %s306_s20 }
  0x5e   : > { %v229_v7 = vsel %vm221_vm0, %v219_v3, -inf  ;;  %s557_s5 = scalar_lea.vmem %s307_s20, 384  ;;  %p564_p4 = scmp.lt.s32.totalorder %s307_s20, %s307_s20 }
  0x5f   : > { %v224_v9 = vmax.f32 %v222_v4, %v223_v5  ;;  %v230_v10 = vrot.slane %v229_v7, 4  ;;  %v272_v11 = vsub.s32 0, %v269_v6  ;;  %v276_v12 = vsub.s32 1, %v269_v6  ;;  %p558_p6 = scmp.ne.s32.totalorder %s307_s20, %s557_s5  ;;  %p565_p1 = scmp.lt.s32.totalorder %s557_s5, %s557_s5 }
  0x61   : > { %v225_v13 = vrot.slane %v224_v9, 2  ;;  %v231_v14 = vmax.f32 %v229_v7, %v230_v10  ;;  %v273_v15 = vrot.slane %v267_v8, %v272_v11  ;;  %v277_v16 = vrot.slane %v267_v8, %v276_v12  ;;  %p559_p2 = pnand %p558_p6, %p817_p9  ;;  %p566_p5 = por %p565_p1, %p564_p4 }
  0x63   : > { %v226_v17 = vmax.f32 %v224_v9, %v225_v13  ;;  %v232_v18 = vrot.slane %v231_v14, 2  ;;  %vm278_vm1 = vcmp.eq.s32.totalorder %v273_v15, %v269_v6  ;;  %vm279_vm2 = vcmp.eq.s32.totalorder %v277_v16, %v269_v6  ;;  %p560_p3 = pneg %p559_p2 }
  0x64   : > { %v410_v20 = vsel %vm278_vm1, 1.0, %v646_v19  ;;  %v411_v21 = vsel %vm279_vm2, 1.0, %v646_v19 }
  0x65   : > { %v227_v23 = vrot.slane %v226_v17, 1  ;;  %v233_v24 = vmax.f32 %v231_v14, %v232_v18  ;;  %v287_v25 = vcombine.low %v410_v20, %v411_v21  ;;  %p567_p10 = pnand %p566_p5, %p560_p3 }
  0x67   : > { %v228_v26 = vmax.f32 %v226_v17, %v227_v23  ;;  %v234_v27 = vrot.slane %v233_v24, 1  ;;  %v298_v28 = vadd.f32 %v297_v22, %v287_v25 }
  0x69   : > { %v235_v29 = vmax.f32 %v233_v24, %v234_v27  ;;  %299 = vst [vmem:[#allocation7 + $0x10] sm:$0xff] %v298_v28 }
  0x6b   : > { %v238_v30 = vcombine.low %v228_v26, %v235_v29 }
  0x6d   : > { %v240_v31 = vsub.f32 %v217_v1, %v238_v30 }
  0x6f   : > { %v241_v32 = vmul.f32 1.442695, %v240_v31 }
  0x71   : > { %491 = vpow2.f32 %v241_v32 }
  0x7b   : > { %v492_v33 = vpop.eup %491 }
  0x7c   : > { %v244_v34 = vcombine.high %v492_v33, %v492_v33  ;;  %v246_v35 = vsel %vm221_vm0, %v492_v33, 0.0 }
  0x7d   : > { %v247_v36 = vrot.slane %v246_v35, 4 }
  0x7e   : > { %v253_v37 = vsel %vm221_vm0, %v244_v34, 0.0 }
  0x7f   : > { %v248_v38 = vadd.f32 %v247_v36, %v246_v35  ;;  %v254_v39 = vrot.slane %v253_v37, 4 }
  0x81   : > { %v249_v40 = vrot.slane %v248_v38, 2  ;;  %v255_v41 = vadd.f32 %v254_v39, %v253_v37 }
  0x83   : > { %v250_v42 = vadd.f32 %v249_v40, %v248_v38  ;;  %v256_v43 = vrot.slane %v255_v41, 2 }
  0x85   : > { %v251_v44 = vrot.slane %v250_v42, 1  ;;  %v257_v45 = vadd.f32 %v256_v43, %v255_v41 }
  0x87   : > { %v252_v46 = vadd.f32 %v251_v44, %v250_v42  ;;  %v258_v47 = vrot.slane %v257_v45, 1 }
  0x89   : > { %v259_v48 = vadd.f32 %v258_v47, %v257_v45  ;;  %493 = vrcp.f32 %v252_v46 }
  0x8b   : > { %495 = vrcp.f32 %v259_v48 }
  0x93   : > { %v494_v49 = vpop.eup %493 }
  0x95   : > { %v496_v50 = vpop.eup %495 }
  0x96   : > { %v264_v51 = vcombine.low %v494_v49, %v496_v50 }
  0x98   : > { %v266_v53 = vmul.f32 %v492_v33, %v264_v51 }
  0x9a   : > { %v289_v55 = vmul.f32 %v287_v25, %v266_v53  ;;  %v294_v56 = vadd.f32 %v293_v52, %v266_v53 }
  0x9c   : > { %v290_v57 = vadd.f32 %v289_v55, %v284_v54  ;;  %295 = vst [vmem:[#allocation7 + $0x8] sm:$0xff] %v294_v56 }
  0x9e   : > { %291 = vst [vmem:[#allocation7] sm:$0xff] %v290_v57 }
  0x9f   : > { %570 = shalt.err (!%p567_p10)
}
  0xa0   : > { %s571_s27 = scalar_lea.hbm %s863_s2, 384 }
  0xa1   : > { %p572_p11 = scmp.ne.s32.totalorder %s863_s2, %s571_s27  ;;  %p577_p8 = scmp.lt.u32.totalorder %s571_s27, %s863_s2 }
  0xa3   : > { %p573_p0 = pnand %p572_p11, %p817_p9 }
  0xa5   : > { %p574_p12 = pneg %p573_p0 }
  0xa7   : > { %p579_p13 = pnand %p577_p8, %p574_p12 }
  0xa9   : > { %582 = shalt.err (!%p579_p13)
}
  0xaa   : > { %s648_s22 = smov 128   ;;  %s649_s19 = smov 8  }
  0xab   : > { %424 = dma.vmem_to_hbm [thread:$0]  (%p817_p9), %s307_s20, 384, %s863_s2, [#allocation4], %s648_s22, %s648_s22, %s649_s19  }
  0xac   : > { %616 = dma.done.wait (%p817_p9), [#allocation4], 384  }
  0xad   : > { %618 = vsyncadd (%p817_p9), [#allocation4], 4294966912 }
  0xae PF: > { %s19_s14 = sadd.s32 1, %s641_s14   ;;  %s874_s9 = smov %s625_s10 }
  0xaf   : > { %p16_p7 = scmp.ge.s32.totalorder %s19_s14, 4   ;;  %s875_s10 = smov %s629_s11 }
  0xb0   : > { %s876_s11 = smov %s716_s21  ;;  %s877_s12 = smov %s637_s13 }
  0xb1   : > { %s878_s13 = smov %s880_s16  ;;  %18 = sbr.rel (!%p16_p7) target bundleno = 7 (0x7), region = 84 }
  0xb8   :  { %322 = vsyncpa [#allocation3], 1 }
  0xb9   :  { %324 = vsyncpa [#allocation3 + $0x1], 1 }
  0xba   :  { %325 = vsyncpa [#allocation6], 1 }
  0xbb   :  { %327 = vsyncpa [#allocation6 + $0x1], 1 }
  0xbc   :  { %328 = vsyncpa [#allocation4], 1 }
  0xbd   :  { %330 = vsyncpa [#allocation4 + $0x1], 1 }

</bundles_post_ra>
